<compile_context>
chip_gen: v7x
topology: tpu7x:2x2x1
jax: 0.10.0
libtpu: 0.0.40
codegen_flags: <defaults>
</compile_context>

<pallas_src>
import jax
import jax.numpy as jnp
from jax.experimental import pallas as pl
from jax.experimental.pallas import tpu as pltpu


# --------------------------- MoE expert-mixture kernel ------------------------
def moe_expert_kernel(x_ref, w1_ref, b1_ref, w2_ref, b2_ref, g_ref, y_ref, acc_ref):
    # x_ref : (tL, H)    f32  token tile for the current (b, l)
    # w1_ref: (E, H, Hh) bf16 VMEM-resident expert weight slab (constant block)
    # b1_ref: (E, 1, Hh) f32
    # w2_ref: (E, Hh, H) bf16
    # b2_ref: (E, 1, H)  f32
    # g_ref : (B, E)     f32 in SMEM (full gate matrix)
    # y_ref : (tL, H)    bf16 output block (written only at e == E-1)
    # acc_ref: (tL, H)   f32 VMEM scratch accumulator, resident across the e axis
    b = pl.program_id(0)
    e = pl.program_id(2)
    n_e = pl.num_programs(2)

    # expert MLP in bf16 on the MXU, f32 accumulation / elementwise math
    x = x_ref[...].astype(jnp.bfloat16)                               # in-kernel cast
    h = jnp.dot(x, w1_ref[e], preferred_element_type=jnp.float32)
    h = jnp.maximum(h + b1_ref[e], 0.0)                               # (tL, Hh) f32
    o = jnp.dot(h.astype(jnp.bfloat16), w2_ref[e],
                preferred_element_type=jnp.float32) + b2_ref[e]       # (tL, H) f32

    go = g_ref[b, e] * o                                              # gate scalar (SMEM)

    @pl.when(e == 0)
    def _():
        acc_ref[...] = go                                             # no zero-init pass

    @pl.when(e > 0)
    def _():
        acc_ref[...] += go

    @pl.when(e == n_e - 1)
    def _():
        y_ref[...] = acc_ref[...].astype(y_ref.dtype)                 # bf16 epilogue


# ------------------------------ param preparation ------------------------------
def prepare_params(params):
    """One-time (outside jit) layout/dtype prep: pre-transpose weights, cast expert
    matmul weights to bf16, keep biases / gate / QA head in f32."""
    E, Hh, H = params["w1"].shape
    return {
        "w1_t": jnp.transpose(params["w1"], (0, 2, 1)).astype(jnp.bfloat16),  # (E,H,Hh)
        "w2_t": jnp.transpose(params["w2"], (0, 2, 1)).astype(jnp.bfloat16),  # (E,Hh,H)
        "b1": params["b1"].reshape(E, 1, Hh).astype(jnp.float32),
        "b2": params["b2"].reshape(E, 1, H).astype(jnp.float32),
        "wg_t": params["wg"].T.astype(jnp.float32),                            # (L*H,E)
        "bg": params["bg"].astype(jnp.float32),
        "wqa_t": params["wqa"].T.astype(jnp.float32),                          # (H,2)
        "bqa": params["bqa"].astype(jnp.float32),
    }


def _token_tile(L, target=1024):
    """Largest tile along L that divides L and is <= target, preferring MXU-aligned
    multiples of 256, then 128, then 16 (bf16 sublane), or the full extent."""
    if L <= target:
        return L
    for align in (256, 128, 16):
        best = 0
        for t in range(align, target + 1, align):
            if L % t == 0:
                best = t
        if best:
            return best
    return L


# ---------------------------------- forward ------------------------------------
def moebert_forward(enc, p):
    """enc: (B, L, H) float32 encoder output; p: prepare_params(...) output.
    Returns (start_logits, end_logits), gate."""
    B, L, H = enc.shape
    E, _, Hh = p["w1_t"].shape
    tL = _token_tile(L)

    # ---- gate = softmax(gateNet(flatten(enc, start_dim=1)))  (tiny N=E matmul,
    #      left to XLA per perf review) ----
    gate = jax.nn.softmax(enc.reshape(B, L * H) @ p["wg_t"] + p["bg"], axis=1)

    y = pl.pallas_call(
        moe_expert_kernel,
        out_shape=jax.ShapeDtypeStruct((B, L, H), jnp.bfloat16),
        grid_spec=pltpu.PrefetchScalarGridSpec(
            num_scalar_prefetch=0,
            grid=(B, L // tL, E),
            in_specs=[
                # token tile: depends on (b, l), stays resident across e
                pl.BlockSpec((pl.Squeezed(), tL, H), lambda b, l, e: (b, l, 0)),
                # expert weight / bias slabs: full arrays, constant index_map
                # -> DMA'd from HBM exactly once, VMEM-resident for the whole grid
                pl.BlockSpec((E, H, Hh), lambda b, l, e: (0, 0, 0)),
                pl.BlockSpec((E, 1, Hh), lambda b, l, e: (0, 0, 0)),
                pl.BlockSpec((E, Hh, H), lambda b, l, e: (0, 0, 0)),
                pl.BlockSpec((E, 1, H), lambda b, l, e: (0, 0, 0)),
                pl.BlockSpec(memory_space=pltpu.MemorySpace.SMEM),  # gate (B,E)
            ],
            out_specs=pl.BlockSpec((pl.Squeezed(), tL, H), lambda b, l, e: (b, l, 0)),
            scratch_shapes=[pltpu.VMEM((tL, H), jnp.float32)],      # f32 accumulator
        ),
        compiler_params=pltpu.CompilerParams(
            dimension_semantics=("parallel", "parallel", "arbitrary"),
            # 64 MiB: enough for full bf16 weight residency at small/medium shapes
            # and still <= v7x physical VMEM; raise toward ~100 MiB on v5e/v6e for
            # full-size MoEBERT residency.
            vmem_limit_bytes=64 * 1024 * 1024),
    )(enc, p["w1_t"], p["b1"], p["w2_t"], p["b2"], gate)

    # ---- QA head (N=2 output lanes -> plain XLA, lane-dense bf16 Y from kernel) ----
    logits = y @ p["wqa_t"] + p["bqa"]            # (B, L, 2) f32 (bf16 @ f32)
    start_logits = logits[..., 0]
    end_logits = logits[..., 1]
    return (start_logits, end_logits), gate


# --------------------------- pure-JAX reference -------------------------------
def moebert_reference(enc, params):
    B, L, H = enc.shape
    E = params["w1"].shape[0]
    gate = jax.nn.softmax(enc.reshape(B, L * H) @ params["wg"].T + params["bg"], axis=1)
    x = enc.reshape(B * L, H)
    outs = []
    for e in range(E):
        h = jnp.maximum(x @ params["w1"][e].T + params["b1"][e], 0.0)
        outs.append(h @ params["w2"][e].T + params["b2"][e])
    exp_outs = jnp.stack(outs, 0)                                 # (E, T, H)
    g = jnp.repeat(gate.T, L, axis=1)[..., None]                  # (E, T, 1)
    Y = jnp.sum(exp_outs * g, axis=0)                             # (T, H)
    logits = (Y @ params["wqa"].T + params["bqa"]).reshape(B, L, 2)
    return (logits[..., 0], logits[..., 1]), gate


# ----------------------------------- main --------------------------------------
def init_params(key, H, Hh, E, L):
    ks = jax.random.split(key, 8)
    def lin(k, fan_in, shape):
        bound = 1.0 / jnp.sqrt(fan_in)
        return jax.random.uniform(k, shape, jnp.float32, -bound, bound)
    return {
        "w1": lin(ks[0], H, (E, Hh, H)),
        "b1": lin(ks[1], H, (E, Hh)),
        "w2": lin(ks[2], Hh, (E, H, Hh)),
        "b2": lin(ks[3], Hh, (E, H)),
        "wg": lin(ks[4], H * L, (E, H * L)),
        "bg": lin(ks[5], H * L, (E,)),
        "wqa": lin(ks[6], H, (2, H)),
        "bqa": lin(ks[7], H, (2,)),
    }


if __name__ == "__main__":
    # Small, module-consistent shapes (real model: H=768, Hh=config.expert_hidden_size,
    # L=max_length, E=num_experts).
    B, L, H, Hh, E = 2, 16, 128, 256, 4

    key = jax.random.PRNGKey(0)
    k_enc, k_par = jax.random.split(key)
    enc = jax.random.normal(k_enc, (B, L, H), jnp.float32)   # encoder output stand-in
    params = init_params(k_par, H, Hh, E, L)

    prepped = prepare_params(params)                          # one-time, outside jit
    fwd = jax.jit(moebert_forward)
    (start_logits, end_logits), gate = jax.block_until_ready(fwd(enc, prepped))

    (ref_start, ref_end), ref_gate = moebert_reference(enc, params)

    assert start_logits.shape == (B, L) and end_logits.shape == (B, L)
    assert gate.shape == (B, E)
    assert jnp.allclose(gate, ref_gate, atol=2e-2, rtol=2e-2)
    assert jnp.allclose(start_logits, ref_start, atol=2e-2, rtol=2e-2)
    assert jnp.allclose(end_logits, ref_end, atol=2e-2, rtol=2e-2)

    print("KERNEL_OK")
</pallas_src>

<mosaic_0001>
module attributes {stable_mosaic.version = 11 : i64} {
  func.func @moe_expert_kernel(%arg0: i32, %arg1: i32, %arg2: i32, %arg3: memref<1x16x128xf32, #tpu.memory_space<vmem>>, %arg4: memref<4x128x256xbf16, #tpu.memory_space<vmem>>, %arg5: memref<4x1x256xf32, #tpu.memory_space<vmem>>, %arg6: memref<4x256x128xbf16, #tpu.memory_space<vmem>>, %arg7: memref<4x1x128xf32, #tpu.memory_space<vmem>>, %arg8: memref<2x4xf32, #tpu.memory_space<smem>>, %arg9: memref<1x16x128xbf16, #tpu.memory_space<vmem>>, %arg10: memref<16x128xf32, #tpu.memory_space<vmem>>) attributes {dimension_semantics = [#tpu.dimension_semantics<parallel>, #tpu.dimension_semantics<parallel>, #tpu.dimension_semantics<arbitrary>], iteration_bounds = array<i64: 2, 1, 4>, scalar_prefetch = 0 : i64, scratch_operands = 1 : i64, tpu.core_type = #tpu.core_type<tc>, window_params = [{transform_indices = @transform_0, window_bounds = array<i64: 1, 16, 128>}, {pipeline_mode = #tpu.pipeline_mode<synchronous>, transform_indices = @transform_1, window_bounds = array<i64: 4, 128, 256>}, {pipeline_mode = #tpu.pipeline_mode<synchronous>, transform_indices = @transform_2, window_bounds = array<i64: 4, 1, 256>}, {pipeline_mode = #tpu.pipeline_mode<synchronous>, transform_indices = @transform_3, window_bounds = array<i64: 4, 256, 128>}, {pipeline_mode = #tpu.pipeline_mode<synchronous>, transform_indices = @transform_4, window_bounds = array<i64: 4, 1, 128>}, {transform_indices = @transform_5, window_bounds = array<i64: 2, 4>}, {transform_indices = @transform_6, window_bounds = array<i64: 1, 16, 128>}]} {
    %c0 = arith.constant 0 : index
    %c0_0 = arith.constant 0 : index
    %c0_1 = arith.constant 0 : index
    %0 = vector.load %arg3[%c0, %c0_0, %c0_1] : memref<1x16x128xf32, #tpu.memory_space<vmem>>, vector<1x16x128xf32>
    %1 = vector.shape_cast %0 : vector<1x16x128xf32> to vector<16x128xf32>
    %2 = arith.truncf %1 : vector<16x128xf32> to vector<16x128xbf16>
    %3 = arith.index_cast %arg2 : i32 to index
    %c0_2 = arith.constant 0 : index
    %c0_3 = arith.constant 0 : index
    %4 = vector.load %arg4[%3, %c0_2, %c0_3] : memref<4x128x256xbf16, #tpu.memory_space<vmem>>, vector<1x128x256xbf16>
    %5 = vector.shape_cast %4 : vector<1x128x256xbf16> to vector<128x256xbf16>
    %cst = arith.constant dense<0.000000e+00> : vector<16x256xf32>
    %6 = tpu.matmul %2, %5, %cst {dimension_numbers = #tpu.dot_dimension_numbers<[1], [0], [0], [1], [0, 0, 1, 1], [], []>} : vector<16x128xbf16>, vector<128x256xbf16>, vector<16x256xf32> -> vector<16x256xf32>
    %7 = arith.index_cast %arg2 : i32 to index
    %c0_4 = arith.constant 0 : index
    %c0_5 = arith.constant 0 : index
    %8 = vector.load %arg5[%7, %c0_4, %c0_5] : memref<4x1x256xf32, #tpu.memory_space<vmem>>, vector<1x1x256xf32>
    %9 = vector.shape_cast %8 : vector<1x1x256xf32> to vector<1x256xf32>
    %10 = vector.broadcast %9 : vector<1x256xf32> to vector<16x256xf32>
    %11 = arith.addf %6, %10 : vector<16x256xf32>
    %cst_6 = arith.constant 0.000000e+00 : f32
    %12 = vector.broadcast %cst_6 : f32 to vector<16x256xf32>
    %13 = arith.maximumf %11, %12 : vector<16x256xf32>
    %14 = arith.truncf %13 : vector<16x256xf32> to vector<16x256xbf16>
    %15 = arith.index_cast %arg2 : i32 to index
    %c0_7 = arith.constant 0 : index
    %c0_8 = arith.constant 0 : index
    %16 = vector.load %arg6[%15, %c0_7, %c0_8] : memref<4x256x128xbf16, #tpu.memory_space<vmem>>, vector<1x256x128xbf16>
    %17 = vector.shape_cast %16 : vector<1x256x128xbf16> to vector<256x128xbf16>
    %cst_9 = arith.constant dense<0.000000e+00> : vector<16x128xf32>
    %18 = tpu.matmul %14, %17, %cst_9 {dimension_numbers = #tpu.dot_dimension_numbers<[1], [0], [0], [1], [0, 0, 1, 1], [], []>} : vector<16x256xbf16>, vector<256x128xbf16>, vector<16x128xf32> -> vector<16x128xf32>
    %19 = arith.index_cast %arg2 : i32 to index
    %c0_10 = arith.constant 0 : index
    %c0_11 = arith.constant 0 : index
    %20 = vector.load %arg7[%19, %c0_10, %c0_11] : memref<4x1x128xf32, #tpu.memory_space<vmem>>, vector<1x1x128xf32>
    %21 = vector.shape_cast %20 : vector<1x1x128xf32> to vector<1x128xf32>
    %22 = vector.broadcast %21 : vector<1x128xf32> to vector<16x128xf32>
    %23 = arith.addf %18, %22 : vector<16x128xf32>
    %24 = arith.index_cast %arg0 : i32 to index
    %25 = arith.index_cast %arg2 : i32 to index
    %26 = memref.load %arg8[%24, %25] : memref<2x4xf32, #tpu.memory_space<smem>>
    %27 = vector.broadcast %26 : f32 to vector<16x128xf32>
    %28 = arith.mulf %27, %23 : vector<16x128xf32>
    %c0_i32 = arith.constant 0 : i32
    %29 = arith.cmpi eq, %arg2, %c0_i32 : i32
    %30 = arith.extui %29 : i1 to i32
    %c0_i32_12 = arith.constant 0 : i32
    %31 = arith.cmpi ne, %30, %c0_i32_12 : i32
    scf.if %31 {
      %c0_16 = arith.constant 0 : index
      %c0_17 = arith.constant 0 : index
      %38 = vector.load %arg10[%c0_16, %c0_17] : memref<16x128xf32, #tpu.memory_space<vmem>>, vector<16x128xf32>
      tpu.vector_store %arg10[%c0_16, %c0_17], %28 {strides = array<i32>} : memref<16x128xf32, #tpu.memory_space<vmem>>, vector<16x128xf32>,
    } else {
    }
    %c0_i32_13 = arith.constant 0 : i32
    %32 = arith.cmpi sgt, %arg2, %c0_i32_13 : i32
    %33 = arith.extui %32 : i1 to i32
    %c0_i32_14 = arith.constant 0 : i32
    %34 = arith.cmpi ne, %33, %c0_i32_14 : i32
    scf.if %34 {
      %c0_16 = arith.constant 0 : index
      %c0_17 = arith.constant 0 : index
      %38 = vector.load %arg10[%c0_16, %c0_17] : memref<16x128xf32, #tpu.memory_space<vmem>>, vector<16x128xf32>
      %39 = arith.addf %38, %28 : vector<16x128xf32>
      %c0_18 = arith.constant 0 : index
      %c0_19 = arith.constant 0 : index
      %40 = vector.load %arg10[%c0_18, %c0_19] : memref<16x128xf32, #tpu.memory_space<vmem>>, vector<16x128xf32>
      tpu.vector_store %arg10[%c0_18, %c0_19], %39 {strides = array<i32>} : memref<16x128xf32, #tpu.memory_space<vmem>>, vector<16x128xf32>,
    } else {
    }
    %c3_i32 = arith.constant 3 : i32
    %35 = arith.cmpi eq, %arg2, %c3_i32 : i32
    %36 = arith.extui %35 : i1 to i32
    %c0_i32_15 = arith.constant 0 : i32
    %37 = arith.cmpi ne, %36, %c0_i32_15 : i32
    scf.if %37 {
      %c0_16 = arith.constant 0 : index
      %c0_17 = arith.constant 0 : index
      %38 = vector.load %arg10[%c0_16, %c0_17] : memref<16x128xf32, #tpu.memory_space<vmem>>, vector<16x128xf32>
      %39 = arith.truncf %38 : vector<16x128xf32> to vector<16x128xbf16>
      %c0_18 = arith.constant 0 : index
      %c0_19 = arith.constant 0 : index
      %c0_20 = arith.constant 0 : index
      %40 = vector.load %arg9[%c0_18, %c0_19, %c0_20] : memref<1x16x128xbf16, #tpu.memory_space<vmem>>, vector<1x16x128xbf16>
      %41 = vector.shape_cast %40 : vector<1x16x128xbf16> to vector<16x128xbf16>
      %42 = vector.shape_cast %39 : vector<16x128xbf16> to vector<1x16x128xbf16>
      tpu.vector_store %arg9[%c0_18, %c0_19, %c0_20], %42 {strides = array<i32>} : memref<1x16x128xbf16, #tpu.memory_space<vmem>>, vector<1x16x128xbf16>,
    } else {
    }
    return
  }
  func.func @transform_0(%arg0: i32, %arg1: i32, %arg2: i32) -> (i32, i32, i32) {
    %c0_i32 = arith.constant 0 : i32
    %c0_i32_0 = arith.constant 0 : i32
    return %arg0, %arg1, %c0_i32 : i32, i32, i32
  }
  func.func @transform_1(%arg0: i32, %arg1: i32, %arg2: i32) -> (i32, i32, i32) {
    %c0_i32 = arith.constant 0 : i32
    %c0_i32_0 = arith.constant 0 : i32
    %c0_i32_1 = arith.constant 0 : i32
    %c0_i32_2 = arith.constant 0 : i32
    return %c0_i32, %c0_i32_0, %c0_i32_1 : i32, i32, i32
  }
  func.func @transform_2(%arg0: i32, %arg1: i32, %arg2: i32) -> (i32, i32, i32) {
    %c0_i32 = arith.constant 0 : i32
    %c0_i32_0 = arith.constant 0 : i32
    %c0_i32_1 = arith.constant 0 : i32
    %c0_i32_2 = arith.constant 0 : i32
    return %c0_i32, %c0_i32_0, %c0_i32_1 : i32, i32, i32
  }
  func.func @transform_3(%arg0: i32, %arg1: i32, %arg2: i32) -> (i32, i32, i32) {
    %c0_i32 = arith.constant 0 : i32
    %c0_i32_0 = arith.constant 0 : i32
    %c0_i32_1 = arith.constant 0 : i32
    %c0_i32_2 = arith.constant 0 : i32
    return %c0_i32, %c0_i32_0, %c0_i32_1 : i32, i32, i32
  }
  func.func @transform_4(%arg0: i32, %arg1: i32, %arg2: i32) -> (i32, i32, i32) {
    %c0_i32 = arith.constant 0 : i32
    %c0_i32_0 = arith.constant 0 : i32
    %c0_i32_1 = arith.constant 0 : i32
    %c0_i32_2 = arith.constant 0 : i32
    return %c0_i32, %c0_i32_0, %c0_i32_1 : i32, i32, i32
  }
  func.func @transform_5(%arg0: i32, %arg1: i32, %arg2: i32) -> (i32, i32) {
    %c0_i32 = arith.constant 0 : i32
    %c0_i32_0 = arith.constant 0 : i32
    %c0_i32_1 = arith.constant 0 : i32
    return %c0_i32, %c0_i32_0 : i32, i32
  }
  func.func @transform_6(%arg0: i32, %arg1: i32, %arg2: i32) -> (i32, i32, i32) {
    %c0_i32 = arith.constant 0 : i32
    %c0_i32_0 = arith.constant 0 : i32
    return %arg0, %arg1, %c0_i32 : i32, i32, i32
  }
}

</mosaic_0001>

<bundles_post_ra>
// kernel: moebert_forward.1
= control target key start
LH: loop header
LB: loop body
LE: loop exit
PB: predicated region body
PF: predicated region fallthrough
CT: control target
= control target key end

     0   :  { %s1870_s0 = inlined_call_operand.hbm [shape: f32[2,16,128], index: 0, kind: input, shape index: {}]   ;;  %s1871_s1 = inlined_call_operand.hbm [shape: bf16[4,128,256], index: 1, kind: input, shape index: {}]   ;;  %s1872_s2 = inlined_call_operand.hbm [shape: f32[4,1,256], index: 2, kind: input, shape index: {}]   ;;  %s1873_s3 = inlined_call_operand.hbm [shape: bf16[4,256,128], index: 3, kind: input, shape index: {}]   ;;  %s1874_s4 = inlined_call_operand.hbm [shape: f32[4,1,128], index: 4, kind: input, shape index: {}]   ;;  %s1875_s5 = inlined_call_operand.hbm [shape: f32[2,4], index: 5, kind: input, shape index: {}]   ;;  %s1876_s6 = inlined_call_operand.hbm [shape: bf16[2,16,128], index: 6, kind: output, shape index: {}]  }
   0x1   :  { %1885 = sst [smem:[#allocation20_spill]] %s1871_s1 }
   0x2   :  { %1886 = sst [smem:[#allocation21_spill]] %s1872_s2 }
   0x3   :  { %1887 = sst [smem:[#allocation22_spill]] %s1876_s6 }
   0x4   :  { %11 = vsyncpa [#allocation4], 0 }
   0x5   :  { %13 = vsyncpa [#allocation4 + $0x1], 0 }
   0x6   :  { %14 = vsyncpa [#allocation8], 0 }
   0x7   :  { %15 = vsyncpa [#allocation11], 0 }
   0x8   :  { %16 = vsyncpa [#allocation6], 0 }
   0x9   :  { %17 = vsyncpa [#allocation5], 0 }
   0xa   :  { %19 = vsyncpa [#allocation5 + $0x1], 0  ;;  %s1492_s21 = smov 0   ;;  %s1494_s22 = smov 0  }
   0xb   :  { %s1496_s23 = smov 0   ;;  %s1498_s24 = smov 0  }
   0xc   :  { %s1500_s25 = smov 0   ;;  %s1502_s26 = smov 0  }
   0xd   :  { %s1504_s27 = smov 0   ;;  %s1506_s28 = smov 0  }
   0xe LB: > { %s1880_s29 = sadd.s32 4294967295, %s1439_s28   ;;  %p908_p0 = scmp.ge.s32.totalorder %s1439_s28, 1  ;;  %s1439_s28 = sphi %s1506_s28, %s25_s28   ;;  %s1435_s27 = sphi %s1504_s27, %s1914_s27   ;;  %s1431_s26 = sphi %s1502_s26, %s1913_s26   ;;  %s1427_s25 = sphi %s1500_s25, %s1912_s25   ;;  %s1423_s24 = sphi %s1498_s24, %s1911_s24   ;;  %s1419_s23 = sphi %s1496_s23, %s1910_s23   ;;  %s1415_s22 = sphi %s1494_s22, %s1909_s22   ;;  %s1411_s21 = sphi %s1492_s21, %s1908_s21  }
   0xf   : > { %p1536_p1 = scmp.eq.s32.totalorder %s1880_s29, 0  ;;  %p210_p2 = scmp.lt.s32.totalorder %s1439_s28, 9 }
  0x10   : > { %s1441_s8 = smov [#allocation7]   ;;  %s1442_s11 = smov [#allocation10]  }
  0x11   : > { %s1888_s30 = scalar_select %p1536_p1, 1, 0 }
  0x12   : > { %p1541_p3 = pnand %p908_p0, %p210_p2  ;;  %s222_s9 = sshll.u32 %s1441_s8, 4  ;;  %s223_s9 = int_to_ptr.vmem [resolvable:$true] %s222_s9 }
  0x13   : > { %s248_s12 = sshll.u32 %s1442_s11, 4  ;;  %s1891_s1 = sld [smem:[#allocation20_spill]]  ;;  %s1553_s12 = int_to_ptr.vmem [resolvable:$true] %s248_s12 }
  0x14   : > { %s1889_s7 = scalar_select %p1541_p3, 1, 0 }
  0x15   : > { %p1020_p4 = pneg %p1541_p3 }
  0x17   : > { %p1549_p5 = pnand %p1020_p4, %p1536_p1 }
  0x19   : > { %s1174_s15 = scalar_lea.hbm %s1891_s1, 8192  ;;  %p1563_p7 = pneg %p1549_p5 }
  0x1a   : > { %p1175_p6 = scmp.ne.s32.totalorder %s1891_s1, %s1174_s15  ;;  %p1181_p10 = scmp.lt.u32.totalorder %s1174_s15, %s1891_s1 }
  0x1c   : > { %p1177_p8 = pnand %p1563_p7, %p1175_p6 }
  0x1e   : > { %p1178_p9 = pneg %p1177_p8 }
  0x20   : > { %p1183_p11 = pnand %p1181_p10, %p1178_p9 }
  0x22   : > { %1186 = shalt.err (!%p1183_p11)
}
  0x23   : > { %s1187_s8 = scalar_lea.vmem %s223_s9, 8192  ;;  %p1195_p2 = scmp.lt.s32.totalorder %s223_s9, %s223_s9 }
  0x24   : > { %p1188_p12 = scmp.ne.s32.totalorder %s223_s9, %s1187_s8  ;;  %p1196_p4 = scmp.lt.s32.totalorder %s1187_s8, %s1187_s8 }
  0x26   : > { %p1190_p13 = pnand %p1188_p12, %p1563_p7  ;;  %p1197_p3 = por %p1196_p4, %p1195_p2 }
  0x28   : > { %p1191_p0 = pneg %p1190_p13 }
  0x2a   : > { %p1198_p1 = pnand %p1197_p3, %p1191_p0 }
  0x2c   : > { %1201 = shalt.err (!%p1198_p1)
}
  0x2d   : > { %s1882_s11 = smov 128   ;;  %s1883_s13 = smov 8  }
  0x2e   : > { %1023 = dma.hbm_to_vmem [thread:$0]  (!%p1549_p5), %s1891_s1, 8192, %s223_s9, [#allocation8], %s1882_s11, %s1882_s11, %s1883_s13  }
  0x2f   : > { %s1202_s19 = scalar_lea.hbm %s1873_s3, 8192 }
  0x30   : > { %p1203_p1 = scmp.ne.s32.totalorder %s1873_s3, %s1202_s19  ;;  %p1209_p8 = scmp.lt.u32.totalorder %s1202_s19, %s1873_s3 }
  0x32   : > { %p1205_p3 = pnand %p1203_p1, %p1563_p7 }
  0x34   : > { %p1206_p6 = pneg %p1205_p3 }
  0x36   : > { %p1211_p9 = pnand %p1209_p8, %p1206_p6 }
  0x38   : > { %1214 = shalt.err (!%p1211_p9)
}
  0x39   : > { %s1215_s9 = scalar_lea.vmem %s1553_s12, 8192  ;;  %p1223_p13 = scmp.lt.s32.totalorder %s1553_s12, %s1553_s12 }
  0x3a   : > { %p1216_p10 = scmp.ne.s32.totalorder %s1553_s12, %s1215_s9  ;;  %p1224_p0 = scmp.lt.s32.totalorder %s1215_s9, %s1215_s9 }
  0x3c   : > { %p1218_p11 = pnand %p1216_p10, %p1563_p7  ;;  %p1225_p2 = por %p1224_p0, %p1223_p13 }
  0x3e   : > { %p1219_p12 = pneg %p1218_p11 }
  0x40   : > { %p1226_p4 = pnand %p1225_p2, %p1219_p12 }
  0x42   : > { %1229 = shalt.err (!%p1226_p4)
}
  0x43   : > { %s1445_s14 = smov 64   ;;  %s1446_s6 = smov 4  }
  0x44   : > { %1029 = dma.hbm_to_vmem [thread:$0]  (!%p1549_p5), %s1873_s3, 8192, %s1553_s12, [#allocation11], %s1445_s14, %s1445_s14, %s1446_s6  }
  0x45   : > { %s1447_s16 = smov [#allocation9]   ;;  %s1893_s2 = sld [smem:[#allocation21_spill]] }
  0x46   : > { %s235_s17 = sshll.u32 %s1447_s16, 4  ;;  %s236_s17 = int_to_ptr.vmem [resolvable:$true] %s235_s17 }
  0x4b   : > { %s1230_s8 = scalar_lea.hbm %s1893_s2, 128 }
  0x4c   : > { %p1231_p1 = scmp.ne.s32.totalorder %s1893_s2, %s1230_s8  ;;  %p1237_p8 = scmp.lt.u32.totalorder %s1230_s8, %s1893_s2 }
  0x4e   : > { %p1233_p3 = pnand %p1231_p1, %p1563_p7 }
  0x50   : > { %p1234_p6 = pneg %p1233_p3 }
  0x52   : > { %p1239_p9 = pnand %p1237_p8, %p1234_p6 }
  0x54   : > { %1242 = shalt.err (!%p1239_p9)
}
  0x55   : > { %s1243_s12 = scalar_lea.vmem %s236_s17, 128  ;;  %p1251_p13 = scmp.lt.s32.totalorder %s236_s17, %s236_s17 }
  0x56   : > { %p1244_p10 = scmp.ne.s32.totalorder %s236_s17, %s1243_s12  ;;  %p1252_p0 = scmp.lt.s32.totalorder %s1243_s12, %s1243_s12 }
  0x58   : > { %p1246_p11 = pnand %p1244_p10, %p1563_p7  ;;  %p1253_p2 = por %p1252_p0, %p1251_p13 }
  0x5a   : > { %p1247_p12 = pneg %p1246_p11 }
  0x5c   : > { %p1254_p4 = pnand %p1253_p2, %p1247_p12 }
  0x5e   : > { %1257 = shalt.err (!%p1254_p4)
}
  0x5f   : > { %s1448_s11 = smov 32   ;;  %s1449_s14 = smov 2  }
  0x60   : > { %1026 = dma.hbm_to_vmem [thread:$0]  (!%p1549_p5), %s1893_s2, 128, %s236_s17, [#allocation8], %s1448_s11, %s1448_s11, %s1449_s14  }
  0x61   : > { %s1450_s6 = smov [#allocation12]   ;;  %s1258_s19 = scalar_lea.hbm %s1874_s4, 64 }
  0x62   : > { %s261_s29 = sshll.u32 %s1450_s6, 4  ;;  %p1259_p1 = scmp.ne.s32.totalorder %s1874_s4, %s1258_s19  ;;  %s262_s29 = int_to_ptr.vmem [resolvable:$true] %s261_s29 }
  0x63   : > { %p1265_p8 = scmp.lt.u32.totalorder %s1258_s19, %s1874_s4 }
  0x64   : > { %p1261_p3 = pnand %p1259_p1, %p1563_p7 }
  0x66   : > { %p1262_p6 = pneg %p1261_p3 }
  0x68   : > { %p1267_p9 = pnand %p1265_p8, %p1262_p6 }
  0x6a   : > { %1270 = shalt.err (!%p1267_p9)
}
  0x6b   : > { %s1271_s17 = scalar_lea.vmem %s262_s29, 64  ;;  %p1279_p13 = scmp.lt.s32.totalorder %s262_s29, %s262_s29 }
  0x6c   : > { %p1272_p10 = scmp.ne.s32.totalorder %s262_s29, %s1271_s17  ;;  %p1280_p0 = scmp.lt.s32.totalorder %s1271_s17, %s1271_s17 }
  0x6e   : > { %p1274_p11 = pnand %p1272_p10, %p1563_p7  ;;  %p1281_p2 = por %p1280_p0, %p1279_p13 }
  0x70   : > { %p1275_p12 = pneg %p1274_p11 }
  0x72   : > { %p1282_p4 = pnand %p1281_p2, %p1275_p12 }
  0x74   : > { %1285 = shalt.err (!%p1282_p4)
}
  0x75   : > { %s1451_s11 = smov 16   ;;  %s1452_s14 = smov 1  }
  0x76   : > { %1032 = dma.hbm_to_vmem [thread:$0]  (!%p1549_p5), %s1874_s4, 64, %s262_s29, [#allocation11], %s1451_s11, %s1451_s11, %s1452_s14  }
  0x77   : > { %s1286_s16 = scalar_lea.hbm %s1875_s5, 32 }
  0x78   : > { %p1287_p1 = scmp.ne.s32.totalorder %s1875_s5, %s1286_s16  ;;  %p1293_p8 = scmp.lt.u32.totalorder %s1286_s16, %s1875_s5 }
  0x7a   : > { %p1289_p3 = pnand %p1287_p1, %p1563_p7 }
  0x7c   : > { %p1290_p6 = pneg %p1289_p3 }
  0x7e   : > { %p1295_p9 = pnand %p1293_p8, %p1290_p6 }
  0x80   : > { %1298 = shalt.err (!%p1295_p9)
}
  0x81   : > { %s1453_s12 = smov [#allocation13]   ;;  %s907_s18 = sadd.s32 4294967294, %s1439_s28  }
  0x82   : > { %1035 = dma.hbm_to_smem (!%p1549_p5), %s1875_s5, 32, %s1453_s12, [#allocation6]  }
  0x83   : > { %s37_s11 = sadd.s32 1, %s1431_s26  ;;  %s44_s14 = sadd.s32 1, %s1435_s27 }
  0x84   : > { %p38_p7 = scmp.ge.s32.totalorder %s37_s11, 4  ;;  %s53_s10 = sadd.s32 1, %s1419_s23 }
  0x85   : > { %p60_p10 = scmp.ne.s32.totalorder %s1419_s23, %s1415_s22  ;;  %p61_p11 = scmp.eq.s32.totalorder %s1439_s28, 0 }
  0x86   : > { %s1916_s11 = smov (%p38_p7, %s37_s11), 0  ;;  %s1918_s14 = smov (!%p38_p7, %s44_s14), %s1435_s27 }
  0x87   : > { %p1667_p12 = por %p61_p11, %p60_p10  ;;  %p66_p5 = scmp.ne.s32.totalorder %s1415_s22, %s1411_s21 }
  0x88   : > { %p46_p13 = scmp.ge.s32.totalorder %s1918_s14, 2  ;;  %s1895_s13 = sadd.s32 4294967295, %s1439_s28  }
  0x89   : > { %p197_p0 = scmp.eq.s32.totalorder %s1895_s13, 7  ;;  %p1896_p2 = scmp.ne.s32.totalorder %s1888_s30, 0 }
  0x8a   : > { %p203_p1 = scmp.eq.s32.totalorder %s907_s18, 7  ;;  %s1920_s14 = smov (%p46_p13, %s1918_s14), 0 }
  0x8b   : > { %p1677_p4 = por %p1896_p2, %p66_p5  ;;  %p1683_p3 = por %p197_p0, %p60_p10 }
  0x8c   : > { %p1687_p6 = por %p203_p1, %p66_p5  ;;  %s48_s19 = ssub.s32 %s1435_s27, %s1920_s14 }
  0x8d   : > { %s1898_s15 = scalar_select %p1683_p3, 1, 0 }
  0x8e   : > { %s1899_s16 = scalar_select %p1687_p6, 1, 0 }
  0x8f   : > { %p1049_p8 = scmp.lt.s32.totalorder %s1439_s28, 8  ;;  %p51_p9 = scmp.eq.s32.totalorder %s48_s19, 0 }
  0x90   : > { %s284_s20 = sand.u32 1, %s1419_s23   ;;  %s971_s12 = sshll.u32 %s1435_s27, 8 }
  0x91   : > { %s915_s8 = sshll.u32 %s284_s20, 4  ;;  %s1702_s18 = scalar_lea.hbm %s1870_s0, %s971_s12 }
  0x92   : > { %s1696_s9 = scalar_select %p51_p9, %s1419_s23, %s53_s10  }
  0x93   : > { %s288_s13 = scalar_lea.vmem [#allocation3], %s915_s8  ;;  %p1708_p7 = pnand %p1049_p8, %p1667_p12 }
  0x94   : > { %s297_s2 = sshll.u32 %s288_s13, 4  ;;  %s1712_s10 = scalar_lea.sflag [#allocation4], %s284_s20  ;;  %s1704_s2 = int_to_ptr.vmem [resolvable:$true] %s297_s2 }
  0x95   : > { %s1299_s29 = scalar_lea.hbm %s1702_s18, 256  ;;  %p1301_p11 = pneg %p1708_p7 }
  0x96   : > { %p1300_p10 = scmp.ne.s32.totalorder %s1702_s18, %s1299_s29  ;;  %s1304_s1 = scalar_lea.hbm %s1870_s0, 512 }
  0x97   : > { %p1305_p12 = scmp.lt.u32.totalorder %s1702_s18, %s1870_s0  ;;  %p1306_p0 = scmp.lt.u32.totalorder %s1304_s1, %s1299_s29 }
  0x98   : > { %p1302_p5 = pnand %p1301_p11, %p1300_p10  ;;  %p1308_p1 = scmp.lt.u32.totalorder %s1299_s29, %s1702_s18 }
  0x99   : > { %p1307_p2 = por %p1306_p0, %p1305_p12 }
  0x9a   : > { %p1303_p13 = pneg %p1302_p5 }
  0x9b   : > { %p1309_p8 = por %p1308_p1, %p1307_p2 }
  0x9d   : > { %p1310_p9 = pnand %p1309_p8, %p1303_p13 }
  0x9f   : > { %1313 = shalt.err (!%p1310_p9)
}
  0xa0   : > { %s1314_s20 = scalar_lea.vmem %s1704_s2, 256  ;;  %s1454_s8 = smov [#allocation3]  }
  0xa1   : > { %p1315_p10 = scmp.ne.s32.totalorder %s1704_s2, %s1314_s20  ;;  %s1319_s12 = sshll.u32 %s1454_s8, 4  ;;  %s1320_s12 = int_to_ptr.vmem [resolvable:$false] %s1319_s12 }
  0xa2   : > { %s1321_s17 = scalar_lea.vmem %s1320_s12, 512  ;;  %p1322_p3 = scmp.lt.s32.totalorder %s1704_s2, %s1320_s12 }
  0xa3   : > { %p1317_p5 = pnand %p1315_p10, %p1301_p11  ;;  %p1323_p12 = scmp.lt.s32.totalorder %s1321_s17, %s1314_s20 }
  0xa5   : > { %p1318_p6 = pneg %p1317_p5  ;;  %p1324_p0 = por %p1323_p12, %p1322_p3 }
  0xa7   : > { %p1325_p2 = pnand %p1324_p0, %p1318_p6 }
  0xa9   : > { %1328 = shalt.err (!%p1325_p2)
}
  0xaa   : > { %s1901_s29 = smov 8   ;;  %s1902_s1 = smov 128  }
  0xab   : > { %1039 = dma.hbm_to_vmem [thread:$0]  (!%p1708_p7), %s1702_s18, 256, %s1704_s2, %s1712_s10, %s1902_s1, %s1902_s1, %s1901_s29  }
  0xac   : > { %p1903_p11 = scmp.ne.s32.totalorder %s1889_s7, 0 }
  0xad   : > { %s1746_s13 = sand.u32 (!%p1903_p11), 1, %s1415_s22  }
  0xae   : > { %309 = sbr.rel (%p1903_p11) target bundleno = 716 (0x2cc), region = 44  ;;  %s919_s20 = sshll.u32 (!%p1903_p11), %s1746_s13, 4 }
  0xaf   : > { %s312_s8 = scalar_lea.sflag (!%p1903_p11), [#allocation4], %s1746_s13  ;;  %s1750_s12 = scalar_lea.vmem (!%p1903_p11), [#allocation3], %s919_s20 }
  0xb5   : > { %1390 = dma.done.wait (%p1677_p4), %s312_s8, 256  }
  0xb6   : > { %1392 = vsyncadd (%p1677_p4), %s312_s8, 4294967040  ;;  %p1904_p3 = scmp.ne.s32.totalorder %s1888_s30, 0 }
  0xb8   : > { %1394 = dma.done.wait (%p1904_p3), [#allocation8], 8320  }
  0xb9   : > { %1396 = vsyncadd (%p1904_p3), [#allocation8], 4294958976 }
  0xba   : > { %1398 = dma.done.wait (%p1904_p3), [#allocation11], 8256  }
  0xbb   : > { %1400 = vsyncadd (%p1904_p3), [#allocation11], 4294959040 }
  0xbc   : > { %1402 = dma.done.wait (%p1904_p3), [#allocation6], 32  }
  0xbd   : > { %1404 = vsyncadd (%p1904_p3), [#allocation6], 4294967264 }
  0xbe   : > { %340 = sfence }
  0xbf   : > { %s925_s2 = sshll.u32 %s1746_s13, 3  ;;  %s972_s7 = sshll.u32 %s1423_s24, 7  ;;  %v1455_v0 = vmov 0   ;;  %v367_v25 = vld [vmem:[%s1750_s12] sm:$0xff]  ;;  %v368_v28 = vld [vmem:[%s1750_s12 + $0x8] sm:$0xff]  ;;  %v393_v36 = vlaneseq }
  0xc0   : > { %515 = vmatprep.mubr.bf16.mxu0 %v1455_v0  ;;  %s1770_s6 = scalar_lea.vmem [#allocation7], %s972_s7  ;;  %s1781_s30 = scalar_lea.vmem [#allocation10], %s972_s7  ;;  %v369_v30 = vpack.c.bf16 %v368_v28, %v367_v25 }
  0xc1   : > { %v1134_v1 = vld [vmem:[%s1770_s6 + $0x4] ss:$8 sps:$4 sm:$0xff]   ;;  %v1136_v2 = vld [vmem:[%s1770_s6] ss:$8 sps:$4 sm:$0xff]   ;;  %v1137_v3 = vld [vmem:[%s1770_s6 + $0x14] ss:$8 sps:$4 sm:$0xff]  }
  0xc2   : > { %483 = vmatprep.subr.bf16.mxu0 %v1134_v1  ;;  %v1139_v4 = vld [vmem:[%s1770_s6 + $0x10] ss:$8 sps:$4 sm:$0xff]   ;;  %v1140_v5 = vld [vmem:[%s1770_s6 + $0x24] ss:$8 sps:$4 sm:$0xff]   ;;  %v1142_v6 = vld [vmem:[%s1770_s6 + $0x20] ss:$8 sps:$4 sm:$0xff]  }
  0xc3   : > { %484 = vmatpush1.bf16.msra.mxu0 %v1136_v2  ;;  %v1143_v7 = vld [vmem:[%s1770_s6 + $0x34] ss:$8 sps:$4 sm:$0xff]   ;;  %v1145_v8 = vld [vmem:[%s1770_s6 + $0x30] ss:$8 sps:$4 sm:$0xff]   ;;  %v1146_v9 = vld [vmem:[%s1770_s6 + $0x44] ss:$8 sps:$4 sm:$0xff]  }
  0xc4   : > { %485 = vmatprep.subr.bf16.mxu0 %v1137_v3  ;;  %v1158_v10 = vld [vmem:[%s1781_s30 + $0x40] sm:$0xff]   ;;  %v1160_v13 = vld [vmem:[%s1781_s30 + $0x48] sm:$0xff]   ;;  %v1162_v15 = vld [vmem:[%s1781_s30 + $0x50] sm:$0xff]   ;;  %s928_s18 = sshll.u32 %s1423_s24, 1  ;;  %v394_v37 = vshrl.u32 %v393_v36, 7  ;;  %s711_s10 = sshra.s32 %s1423_s24, 7 }
  0xc5   : > { %v1159_v11 = vld [vmem:[%s1781_s30] sm:$0xff]   ;;  %974 = vmatprep.subr.bf16.mxu1 %v1158_v10  ;;  %v1161_v14 = vld [vmem:[%s1781_s30 + $0x8] sm:$0xff]   ;;  %v1149_v16 = vld [vmem:[%s1770_s6 + $0x54] ss:$8 sps:$4 sm:$0xff]   ;;  %s390_s19 = scalar_lea.vmem [#allocation9], %s928_s18  ;;  %s713_s17 = sadd.s32 %s1427_s25, %s711_s10 }
  0xc6   : > { %v1148_v12 = vld [vmem:[%s1770_s6 + $0x40] ss:$8 sps:$4 sm:$0xff]   ;;  %975 = vmatpush3.bf16.msra.mxu1 %v1159_v11  ;;  %v1151_v17 = vld [vmem:[%s1770_s6 + $0x50] ss:$8 sps:$4 sm:$0xff]   ;;  %v1152_v20 = vld [vmem:[%s1770_s6 + $0x64] ss:$8 sps:$4 sm:$0xff]  }
  0xc7   : > { %486 = vmatpush1.bf16.msra.mxu0 %v1139_v4  ;;  %976 = vmatprep.subr.bf16.mxu1 %v1160_v13  ;;  %v1163_v18 = vld [vmem:[%s1781_s30 + $0x10] sm:$0xff]   ;;  %v1164_v19 = vld [vmem:[%s1781_s30 + $0x58] sm:$0xff]   ;;  %v1154_v21 = vld [vmem:[%s1770_s6 + $0x60] ss:$8 sps:$4 sm:$0xff]   ;;  %v395_v38 = vsub.s32 0, %v394_v37  ;;  %v399_v40 = vsub.s32 1, %v394_v37 }
  0xc8   : > { %487 = vmatprep.subr.bf16.mxu0 %v1140_v5  ;;  %v1165_v22 = vld [vmem:[%s1781_s30 + $0x18] sm:$0xff]   ;;  %v1166_v23 = vld [vmem:[%s1781_s30 + $0x60] sm:$0xff]   ;;  %v1168_v29 = vld [vmem:[%s1781_s30 + $0x68] sm:$0xff]   ;;  %s963_s29 = sshll.u32 %s713_s17, 7  ;;  %s716_s1 = sand.u32 127, %s1423_s24 }
  0xc9   : > { %v1155_v24 = vld [vmem:[%s1770_s6 + $0x74] ss:$8 sps:$4 sm:$0xff]   ;;  %v1167_v26 = vld [vmem:[%s1781_s30 + $0x20] sm:$0xff]   ;;  %v1157_v27 = vld [vmem:[%s1770_s6 + $0x70] ss:$8 sps:$4 sm:$0xff]   ;;  %s717_s20 = sadd.s32 %s963_s29, %s716_s1  ;;  %s566_s12 = scalar_lea.vmem [#allocation12], %s1423_s24 }
  0xca   : > { %977 = vmatpush3.bf16.msra.mxu1 %v1161_v14  ;;  %v1169_v31 = vld [vmem:[%s1781_s30 + $0x28] sm:$0xff]   ;;  %v1170_v32 = vld [vmem:[%s1781_s30 + $0x70] sm:$0xff]   ;;  %v1172_v34 = vld [vmem:[%s1781_s30 + $0x78] sm:$0xff]   ;;  %s718_s8 = sld [smem:[#allocation13 + %s717_s20]]  ;;  %s364_s7 = scalar_lea.vmem [#allocation14], %s925_s2 }
  0xcb   : > { %488 = vmatpush1.bf16.msra.mxu0 %v1142_v6  ;;  %978 = vmatprep.subr.bf16.mxu1 %v1162_v15  ;;  %v1171_v33 = vld [vmem:[%s1781_s30 + $0x30] sm:$0xff]   ;;  %v1173_v35 = vld [vmem:[%s1781_s30 + $0x38] sm:$0xff]   ;;  %v391_v39 = vld [vmem:[%s390_s19] sm:$0x3]  ;;  %p964_p4 = scmp.ne.s32.totalorder %s1423_s24, 0 }
  0xcc   : > { %489 = vmatprep.subr.bf16.mxu0 %v1143_v7  ;;  %v396_v41 = vrot.slane %v391_v39, %v395_v38  ;;  %v400_v42 = vrot.slane %v391_v39, %v399_v40  ;;  %v946_v58 = vld [vmem:[%s566_s12] ss:$0 sm:$0xff] }
  0xce   : > { %979 = vmatpush3.bf16.msra.mxu1 %v1163_v18 }
  0xcf   : > { %490 = vmatpush1.bf16.msra.mxu0 %v1145_v8  ;;  %980 = vmatprep.subr.bf16.mxu1 %v1164_v19 }
  0xd0   : > { %491 = vmatprep.subr.bf16.mxu0 %v1146_v9  ;;  %v719_v62 = vstv %s718_s8 }
  0xd2   : > { %981 = vmatpush3.bf16.msra.mxu1 %v1165_v22 }
  0xd3   : > { %492 = vmatpush1.bf16.msra.mxu0 %v1148_v12  ;;  %982 = vmatprep.subr.bf16.mxu1 %v1166_v23 }
  0xd4   : > { %493 = vmatprep.subr.bf16.mxu0 %v1149_v16 }
  0xd6   : > { %983 = vmatpush3.bf16.msra.mxu1 %v1167_v26 }
  0xd7   : > { %494 = vmatpush1.bf16.msra.mxu0 %v1151_v17  ;;  %984 = vmatprep.subr.bf16.mxu1 %v1168_v29 }
  0xd8   : > { %495 = vmatprep.subr.bf16.mxu0 %v1152_v20 }
  0xda   : > { %985 = vmatpush3.bf16.msra.mxu1 %v1169_v31 }
  0xdb   : > { %496 = vmatpush1.bf16.msra.mxu0 %v1154_v21  ;;  %986 = vmatprep.subr.bf16.mxu1 %v1170_v32 }
  0xdc   : > { %497 = vmatprep.subr.bf16.mxu0 %v1155_v24 }
  0xde   : > { %987 = vmatpush3.bf16.msra.mxu1 %v1171_v33 }
  0xdf   : > { %498 = vmatpush1.bf16.msra.mxu0 %v1157_v27  ;;  %988 = vmatprep.subr.bf16.mxu1 %v1172_v34 }
  0xe2   : > { %516 = vmatmul.mubr.bf16.vlgmr.msra.gmra.mrb[0].mxu0 %v369_v30  ;;  %989 = vmatpush3.bf16.msra.mxu1 %v1173_v35 }
 0x1b5   : > { %v517_v43 = vpop.f32.mrb[0].mxu0 }
 0x1b6   : > { %v518_v44 = vadd.f32 %v517_v43, %v396_v41  ;;  %v519_v45 = vpop.f32.mrb[1].mxu0 }
 0x1b7   : > { %v520_v46 = vadd.f32 %v519_v45, %v400_v42  ;;  %v521_v47 = vpop.f32.mrb[2].mxu0 }
 0x1b8   : > { %v522_v48 = vadd.f32 %v521_v47, %v396_v41  ;;  %v523_v49 = vpop.f32.mrb[3].mxu0  ;;  %v526_v51 = vmax.f32 %v518_v44, 0.0 }
 0x1b9   : > { %v524_v50 = vadd.f32 %v523_v49, %v400_v42  ;;  %v527_v53 = vmax.f32 %v520_v46, 0.0 }
 0x1ba   : > { %v528_v52 = vmax.f32 %v522_v48, 0.0 }
 0x1bb   : > { %v529_v54 = vmax.f32 %v524_v50, 0.0 }
 0x1bc   : > { %v530_v55 = vpack.c.bf16 %v528_v52, %v526_v51 }
 0x1bd   : > { %v531_v56 = vpack.c.bf16 %v529_v54, %v527_v53 }
 0x1bf   : > { %702 = vmatprep.mubr.bf16.mxu1 %v531_v56 }
 0x1c0   : > { %703 = vmatmul.mubr.bf16.vlgmr.msra.gmra.mrb[0].mxu1 %v530_v55 }
 0x293   : > { %v990_v57 = vpop.f32.mrb[0].mxu1 }
 0x294   : > { %v991_v59 = vpop.f32.mrb[1].mxu1 }
 0x295   : > { %v992_v60 = vadd.f32 %v991_v59, %v990_v57  ;;  %v993_v61 = vpop.f32.mrb[2].mxu1  ;;  %725 = sbr.rel (%p964_p4) target bundleno = 670 (0x29e), region = 72 }
 0x296   : > { %v994_v63 = vpop.f32.mrb[3].mxu1 }
 0x297   : > { %v705_v0 = vadd.f32 %v992_v60, %v946_v58  ;;  %v995_v1 = vadd.f32 %v994_v63, %v993_v61 }
 0x299   : > { %v720_v2 = vmul.f32 %v719_v62, %v705_v0  ;;  %v708_v3 = vadd.f32 %v995_v1, %v946_v58 }
 0x29b   : > { %v721_v4 = vmul.f32 %v719_v62, %v708_v3  ;;  %726 = vst [vmem:[#allocation2] sm:$0xff] (!%p964_p4), %v720_v2 }
 0x29d   : > { %727 = vst [vmem:[#allocation2 + $0x8] sm:$0xff] %v721_v4 }
 0x29e PF: > { %p965_p6 = scmp.le.s32.totalorder %s1423_s24, 0 }
 0x2a0   : > { %731 = sbr.rel (%p965_p6) target bundleno = 680 (0x2a8), region = 76 }
 0x2a4   : > { %v732_v5 = vld [vmem:[#allocation2] sm:$0xff] (!%p965_p6)  ;;  %v733_v6 = vld [vmem:[#allocation2 + $0x8] sm:$0xff] (!%p965_p6) }
 0x2a5   : > { %v734_v7 = vadd.f32 (!%p965_p6), %v732_v5, %v720_v2  ;;  %v735_v8 = vadd.f32 (!%p965_p6), %v733_v6, %v721_v4 }
 0x2a7   : > { %736 = vst [vmem:[#allocation2] sm:$0xff] %v734_v7  ;;  %737 = vst [vmem:[#allocation2 + $0x8] sm:$0xff] %v735_v8 }
 0x2a8 PF: > { %p966_p7 = scmp.ne.s32.totalorder %s1423_s24, 3 }
 0x2aa   : > { %741 = sbr.rel (%p966_p7) target bundleno = 690 (0x2b2), region = 80 }
 0x2ae   : > { %v742_v9 = vld [vmem:[#allocation2] sm:$0xff] (!%p966_p7)  ;;  %v743_v10 = vld [vmem:[#allocation2 + $0x8] sm:$0xff] (!%p966_p7) }
 0x2af   : > { %v744_v11 = vpack.c.bf16 (!%p966_p7), %v743_v10, %v742_v9 }
 0x2b1   : > { %745 = vst [vmem:[%s364_s7] sm:$0xff] %v744_v11 }
 0x2b2 PF: > { %s968_s2 = sshll.u32 %s1427_s25, 7  ;;  %s1905_s18 = sld [smem:[#allocation22_spill]] }
 0x2b3   : > { %s761_s10 = sshll.u32 %s364_s7, 4  ;;  %s747_s17 = scalar_lea.sflag [#allocation5], %s1746_s13  ;;  %s762_s10 = int_to_ptr.vmem [resolvable:$true] %s761_s10 }
 0x2b4   : > { %s1329_s29 = scalar_lea.vmem %s762_s10, 128  ;;  %p1906_p1 = scmp.ne.s32.totalorder %s1898_s15, 0 }
 0x2b5   : > { %p1330_p13 = scmp.ne.s32.totalorder %s762_s10, %s1329_s29  ;;  %s1456_s24 = smov [#allocation14]  }
 0x2b6   : > { %s1333_s1 = sshll.u32 %s1456_s24, 4  ;;  %s1334_s1 = int_to_ptr.vmem [resolvable:$false] %s1333_s1 }
 0x2b7   : > { %p1331_p8 = pnand %p1330_p13, %p1906_p1  ;;  %s1335_s20 = scalar_lea.vmem %s1334_s1, 256 }
 0x2b8   : > { %s1822_s19 = scalar_lea.hbm %s1905_s18, %s968_s2  ;;  %p1336_p10 = scmp.lt.s32.totalorder %s762_s10, %s1334_s1 }
 0x2b9   : > { %p1332_p9 = pneg %p1331_p8  ;;  %p1337_p5 = scmp.lt.s32.totalorder %s1335_s20, %s1329_s29 }
 0x2bb   : > { %p1338_p12 = por %p1337_p5, %p1336_p10 }
 0x2bd   : > { %p1339_p0 = pnand %p1338_p12, %p1332_p9 }
 0x2bf   : > { %1342 = shalt.err (!%p1339_p0)
}
 0x2c0   : > { %s1343_s25 = scalar_lea.hbm %s1822_s19, 128  ;;  %s1347_s12 = scalar_lea.hbm %s1905_s18, 256 }
 0x2c1   : > { %p1344_p2 = scmp.ne.s32.totalorder %s1822_s19, %s1343_s25  ;;  %p1348_p4 = scmp.lt.u32.totalorder %s1822_s19, %s1905_s18 }
 0x2c2   : > { %p1349_p6 = scmp.lt.u32.totalorder %s1347_s12, %s1343_s25  ;;  %p1351_p13 = scmp.lt.u32.totalorder %s1343_s25, %s1822_s19 }
 0x2c3   : > { %p1345_p11 = pnand %p1344_p2, %p1906_p1 }
 0x2c4   : > { %p1350_p7 = por %p1349_p6, %p1348_p4 }
 0x2c5   : > { %p1346_p3 = pneg %p1345_p11 }
 0x2c6   : > { %p1352_p8 = por %p1351_p13, %p1350_p7 }
 0x2c8   : > { %p1353_p9 = pnand %p1352_p8, %p1346_p3 }
 0x2ca   : > { %1356 = shalt.err (!%p1353_p9)
}
 0x2cb   : > { %1018 = dma.vmem_to_hbm [thread:$0]  (%p1906_p1), %s762_s10, 128, %s1822_s19, %s747_s17  }
 0x2cc PF: > { %p1055_p10 = scmp.ge.s32.totalorder %s1439_s28, 2  ;;  %s773_s6 = sand.u32 1, %s1411_s21  }
 0x2cd   : > { %p1907_p5 = scmp.ne.s32.totalorder %s1899_s16, 0  ;;  %s774_s30 = scalar_lea.sflag [#allocation5], %s773_s6 }
 0x2cf   : > { %p1041_p12 = pnand %p1055_p10, %p1907_p5 }
 0x2d1   : > { %1406 = dma.done.wait (!%p1041_p12), %s774_s30, 128  }
 0x2d2   : > { %1408 = vsyncadd (!%p1041_p12), %s774_s30, 4294967168  ;;  %s25_s28 = sadd.s32 1, %s1439_s28   ;;  %s1908_s21 = smov %s1415_s22 }
 0x2d3   : > { %p22_p0 = scmp.ge.s32.totalorder %s25_s28, 10   ;;  %s1909_s22 = smov %s1419_s23 }
 0x2d4   : > { %s1910_s23 = smov %s1696_s9  ;;  %s1911_s24 = smov %s1431_s26 }
 0x2d5   : > { %s1912_s25 = smov %s1435_s27  ;;  %s1913_s26 = smov %s1916_s11 }
 0x2d6   : > { %s1914_s27 = smov %s1920_s14  ;;  %24 = sbr.rel (!%p22_p0) target bundleno = 14 (0xe), region = 126 }
 0x2dd   :  { %779 = vsyncpa [#allocation4], 1 }
 0x2de   :  { %781 = vsyncpa [#allocation4 + $0x1], 1 }
 0x2df   :  { %782 = vsyncpa [#allocation8], 1 }
 0x2e0   :  { %783 = vsyncpa [#allocation11], 1 }
 0x2e1   :  { %784 = vsyncpa [#allocation5], 1 }
 0x2e2   :  { %786 = vsyncpa [#allocation5 + $0x1], 1 }
 0x2e3   :  { %787 = vsyncpa [#allocation6], 1 }
 0x2e4   :  { %789 = vsyncpa [#allocation6 + $0x1], 1 }

</bundles_post_ra>
